<compile_context>
chip_gen: v6e
topology: v6e:2x2x1
jax: 0.10.0
libtpu: 0.0.40
codegen_flags: <defaults>
</compile_context>

<pallas_src>
import functools

import jax
import jax.numpy as jnp
from jax.experimental import pallas as pl
from jax.experimental.pallas import tpu as pltpu


# --------------------------------------------------------------------------
# Fused cross-attention kernel (projections + attention + output projection)
# --------------------------------------------------------------------------
def cross_attn_kernel(q_ref, kv_ref,
                      wq_ref, bq_ref, wk_ref, bk_ref, wv_ref, bv_ref,
                      wp_ref, bp_ref,
                      o_ref,
                      kh_ref, vh_ref,
                      *, num_heads, scale):
    """q_ref : (1, TN, dim) bf16   current q row-tile of one batch element
       kv_ref: (1, NK, dim) bf16   full key/value sequence of that batch element
       wq/wk/wv_ref: (H, dim, hd) bf16 head-major projection weights
       bq/bk/bv_ref: (H, 1, hd)   f32  head-major projection biases
       wp_ref: (H, hd, C) bf16    output projection split along its input dim
       bp_ref: (1, C)     f32
       o_ref : (1, TN, C) f32
       kh_ref/vh_ref: VMEM scratch (H, NK, hd) bf16 -- projected K/V cached per
       batch element (filled only on the first q tile of that batch element)."""
    tn = q_ref.shape[1]
    c = wp_ref.shape[2]

    # ---- K/V projections: once per batch element, reused for every q tile ----
    @pl.when(pl.program_id(1) == 0)
    def _():
        kv = kv_ref[0]                                       # (NK, dim) bf16

        def kv_body(h, carry):
            kh = jnp.dot(kv, wk_ref[h],
                         preferred_element_type=jnp.float32) + bk_ref[h]
            vh = jnp.dot(kv, wv_ref[h],
                         preferred_element_type=jnp.float32) + bv_ref[h]
            kh_ref[h] = kh.astype(kh_ref.dtype)
            vh_ref[h] = vh.astype(vh_ref.dtype)
            return carry

        jax.lax.fori_loop(0, num_heads, kv_body, 0)

    # ---- per-head attention, folded straight into the output projection ----
    q = q_ref[0]                                             # (TN, dim) bf16

    def head_body(h, acc):
        qh = (jnp.dot(q, wq_ref[h], preferred_element_type=jnp.float32)
              + bq_ref[h]).astype(jnp.bfloat16)              # (TN, hd) bf16
        kh = kh_ref[h]                                       # (NK, hd) bf16
        vh = vh_ref[h]                                       # (NK, hd) bf16
        # scores: contract over head_dim, no explicit transpose
        s = jax.lax.dot_general(qh, kh, (((1,), (1,)), ((), ())),
                                preferred_element_type=jnp.float32) * scale
        s = s - jnp.max(s, axis=-1, keepdims=True)           # stable softmax (f32)
        e = jnp.exp(s)
        inv = pl.reciprocal(jnp.sum(e, axis=-1, keepdims=True), approx=True)
        p = (e * inv).astype(jnp.bfloat16)                   # (TN, NK) bf16
        ctx = jnp.dot(p, vh, preferred_element_type=jnp.float32)   # (TN, hd) f32
        # this head's slice of the output projection, full lane width (TN, C):
        return acc + jnp.dot(ctx.astype(jnp.bfloat16), wp_ref[h],
                             preferred_element_type=jnp.float32)

    acc = jax.lax.fori_loop(0, num_heads, head_body,
                            jnp.zeros((tn, c), jnp.float32))
    o_ref[0] = (acc + bp_ref[...]).astype(o_ref.dtype)       # single lane-dense store


# --------------------------------------------------------------------------
# Wrapper
# --------------------------------------------------------------------------
def _padded_bytes(shape, itemsize):
    """Rough VMEM footprint of one buffer ((8,128) tile padding on last 2 dims)."""
    s = list(shape)
    s[-1] = -(-s[-1] // 128) * 128
    if len(s) >= 2:
        s[-2] = -(-s[-2] // 8) * 8
    n = 1
    for d in s:
        n *= d
    return n * itemsize


class CrossAttentionPallas:
    def __init__(self, dim, out_dim, num_heads=8, qkv_bias=False, qk_scale=None,
                 attn_drop=0.0, proj_drop=0.0, params=None):
        assert out_dim % num_heads == 0
        self.dim = dim
        self.out_dim = out_dim
        self.num_heads = num_heads
        self.head_dim = out_dim // num_heads
        self.scale = qk_scale or self.head_dim ** (-0.5)
        self.params = params                      # original f32 params (reference)

        H, hd, C = num_heads, self.head_dim, out_dim
        p = params

        def head_major(w):                        # (dim, C) -> (H, dim, hd), bf16
            return jnp.transpose(w.reshape(dim, H, hd), (1, 0, 2)).astype(jnp.bfloat16)

        def head_bias(b):                         # (1, C) -> (H, 1, hd), f32
            return b.reshape(H, 1, hd).astype(jnp.float32)

        # Pre-packed (one-time, outside the kernel) head-major bf16 weights.
        self.wq = head_major(p['wq']); self.bq = head_bias(p['bq'])
        self.wk = head_major(p['wk']); self.bk = head_bias(p['bk'])
        self.wv = head_major(p['wv']); self.bv = head_bias(p['bv'])
        self.wp = p['wp'].reshape(H, hd, C).astype(jnp.bfloat16)    # (H, hd, C)
        self.bp = p['bp'].astype(jnp.float32)                       # (1, C)

    def __call__(self, q, v):
        B, N, dim = q.shape
        NK = v.shape[1]
        C = self.out_dim
        H = self.num_heads
        hd = self.head_dim

        # q row-tile: as large as possible (amortizes per-step overhead and
        # reuses the resident weights / cached K-V over more rows).
        if N <= 512:
            TN = N
        else:
            TN = next((t for t in (512, 256, 128) if N % t == 0), None)
            assert TN is not None, "N must be a multiple of 128 when N > 512"

        # bf16 inputs: halves HBM DMA bytes; matmuls accumulate in f32.
        q_bf = q.astype(jnp.bfloat16)
        kv_bf = v.astype(jnp.bfloat16)

        # VMEM budget: estimate (double-buffered tiles + resident weights +
        # K/V cache scratch), cap at 75% of physical VMEM (v7x has only 64 MiB).
        est = (
            2 * _padded_bytes((TN, dim), 2)
            + 2 * _padded_bytes((NK, dim), 2)
            + 2 * _padded_bytes((TN, C), 4)
            + 2 * (3 * _padded_bytes((H, dim, hd), 2)
                   + _padded_bytes((H, hd, C), 2)
                   + 3 * _padded_bytes((H, 1, hd), 4)
                   + _padded_bytes((1, C), 4))
            + 2 * _padded_bytes((H, NK, hd), 2)
        )
        try:
            vmem_cap = pltpu.get_tpu_info().vmem_capacity_bytes
        except Exception:
            vmem_cap = 64 * 1024 * 1024
        vmem_limit = int(min(max(32 * 1024 * 1024, 2 * est), 0.75 * vmem_cap))

        kernel = functools.partial(cross_attn_kernel,
                                   num_heads=H, scale=self.scale)

        def const_spec(arr):
            zeros = (0,) * arr.ndim
            return pl.BlockSpec(arr.shape, lambda b, n, _z=zeros: _z)

        out = pl.pallas_call(
            kernel,
            out_shape=jax.ShapeDtypeStruct((B, N, C), jnp.float32),
            grid=(B, N // TN),
            in_specs=[
                pl.BlockSpec((1, TN, dim), lambda b, n: (b, n, 0)),   # q tile
                pl.BlockSpec((1, NK, dim), lambda b, n: (b, 0, 0)),   # full k/v
                const_spec(self.wq), const_spec(self.bq),
                const_spec(self.wk), const_spec(self.bk),
                const_spec(self.wv), const_spec(self.bv),
                const_spec(self.wp), const_spec(self.bp),
            ],
            out_specs=pl.BlockSpec((1, TN, C), lambda b, n: (b, n, 0)),
            scratch_shapes=[pltpu.VMEM((H, NK, hd), jnp.bfloat16),    # cached K
                            pltpu.VMEM((H, NK, hd), jnp.bfloat16)],   # cached V
            compiler_params=pltpu.CompilerParams(
                # B stays "parallel" (megacore); N is "arbitrary" so the
                # per-batch K/V cache carried in scratch is legal.
                dimension_semantics=("parallel", "arbitrary"),
                vmem_limit_bytes=vmem_limit),
        )(q_bf, kv_bf, self.wq, self.bq, self.wk, self.bk,
          self.wv, self.bv, self.wp, self.bp)
        return out


# --------------------------------------------------------------------------
# Deterministic parameter construction (channel-last: y = x @ W + b)
# --------------------------------------------------------------------------
def init_cross_attention_params(key, dim, out_dim, qkv_bias=False):
    ks = jax.random.split(key, 4)

    def lin(k, cin, cout, bias):
        w = jax.random.normal(k, (cin, cout), jnp.float32) / jnp.sqrt(float(cin))
        if bias:
            b = 0.05 * jax.random.normal(jax.random.fold_in(k, 1), (cout,), jnp.float32)
        else:
            b = jnp.zeros((cout,), jnp.float32)
        return w, b.reshape(1, cout)

    wq, bq = lin(ks[0], dim, out_dim, qkv_bias)
    wk, bk = lin(ks[1], dim, out_dim, qkv_bias)
    wv, bv = lin(ks[2], dim, out_dim, qkv_bias)
    wp, bp = lin(ks[3], out_dim, out_dim, True)   # proj always has bias
    return {'wq': wq, 'bq': bq, 'wk': wk, 'bk': bk,
            'wv': wv, 'bv': bv, 'wp': wp, 'bp': bp}


# --------------------------------------------------------------------------
# Pure-JAX f32 reference mirroring the PyTorch forward (for sanity checking)
# --------------------------------------------------------------------------
def reference_forward(model, q, v):
    p = model.params
    B, N, _ = q.shape
    NK = v.shape[1]
    C = model.out_dim
    H = model.num_heads
    hd = C // H
    qp = q @ p['wq'] + p['bq']
    kp = v @ p['wk'] + p['bk']
    vp = v @ p['wv'] + p['bv']
    qh = qp.reshape(B, N, H, hd).transpose(0, 2, 1, 3)
    kh = kp.reshape(B, NK, H, hd).transpose(0, 2, 1, 3)
    vh = vp.reshape(B, NK, H, hd).transpose(0, 2, 1, 3)
    attn = jnp.einsum('bhnd,bhmd->bhnm', qh, kh) * model.scale
    attn = jax.nn.softmax(attn, axis=-1)
    x = jnp.einsum('bhnm,bhmd->bhnd', attn, vh)
    x = x.transpose(0, 2, 1, 3).reshape(B, N, C)
    return x @ p['wp'] + p['bp']


if __name__ == "__main__":
    # Small shapes consistent with the module: batch=2, q-seq=16, kv-seq=8,
    # dim=32, out_dim=32, num_heads=8 (head_dim=4).
    B, N, NK, DIM, OUT_DIM, HEADS = 2, 16, 8, 32, 32, 8

    key = jax.random.PRNGKey(0)
    kq, kv_in, kpar = jax.random.split(key, 3)
    q_in = jax.random.normal(kq, (B, N, DIM), jnp.float32)
    v_in = jax.random.normal(kv_in, (B, NK, DIM), jnp.float32)

    params = init_cross_attention_params(kpar, DIM, OUT_DIM, qkv_bias=False)
    model = CrossAttentionPallas(DIM, OUT_DIM, num_heads=HEADS,
                                 qkv_bias=False, params=params)

    out = model(q_in, v_in)
    jax.block_until_ready(out)

    assert out.shape == (B, N, OUT_DIM)
    ref = reference_forward(model, q_in, v_in)
    # Tolerance sized for intentional bf16 MXU operands + approx reciprocal.
    err = float(jnp.max(jnp.abs(out - ref)))
    assert err < 5e-2, f"max abs diff {err}"

    print("KERNEL_OK")
</pallas_src>

<mosaic_0001>
module attributes {stable_mosaic.version = 11 : i64} {
  func.func @cross_attn_kernel(%arg0: i32, %arg1: i32, %arg2: memref<1x16x32xbf16, #tpu.memory_space<vmem>>, %arg3: memref<1x8x32xbf16, #tpu.memory_space<vmem>>, %arg4: memref<8x32x4xbf16, #tpu.memory_space<vmem>>, %arg5: memref<8x1x4xf32, #tpu.memory_space<vmem>>, %arg6: memref<8x32x4xbf16, #tpu.memory_space<vmem>>, %arg7: memref<8x1x4xf32, #tpu.memory_space<vmem>>, %arg8: memref<8x32x4xbf16, #tpu.memory_space<vmem>>, %arg9: memref<8x1x4xf32, #tpu.memory_space<vmem>>, %arg10: memref<8x4x32xbf16, #tpu.memory_space<vmem>>, %arg11: memref<1x32xf32, #tpu.memory_space<vmem>>, %arg12: memref<1x16x32xf32, #tpu.memory_space<vmem>>, %arg13: memref<8x8x4xbf16, #tpu.memory_space<vmem>>, %arg14: memref<8x8x4xbf16, #tpu.memory_space<vmem>>) attributes {dimension_semantics = [#tpu.dimension_semantics<parallel>, #tpu.dimension_semantics<arbitrary>], iteration_bounds = array<i64: 2, 1>, scalar_prefetch = 0 : i64, scratch_operands = 2 : i64, tpu.core_type = #tpu.core_type<tc>, window_params = [{transform_indices = @transform_0, window_bounds = array<i64: 1, 16, 32>}, {transform_indices = @transform_1, window_bounds = array<i64: 1, 8, 32>}, {pipeline_mode = #tpu.pipeline_mode<synchronous>, transform_indices = @transform_2, window_bounds = array<i64: 8, 32, 4>}, {pipeline_mode = #tpu.pipeline_mode<synchronous>, transform_indices = @transform_3, window_bounds = array<i64: 8, 1, 4>}, {pipeline_mode = #tpu.pipeline_mode<synchronous>, transform_indices = @transform_4, window_bounds = array<i64: 8, 32, 4>}, {pipeline_mode = #tpu.pipeline_mode<synchronous>, transform_indices = @transform_5, window_bounds = array<i64: 8, 1, 4>}, {pipeline_mode = #tpu.pipeline_mode<synchronous>, transform_indices = @transform_6, window_bounds = array<i64: 8, 32, 4>}, {pipeline_mode = #tpu.pipeline_mode<synchronous>, transform_indices = @transform_7, window_bounds = array<i64: 8, 1, 4>}, {pipeline_mode = #tpu.pipeline_mode<synchronous>, transform_indices = @transform_8, window_bounds = array<i64: 8, 4, 32>}, {pipeline_mode = #tpu.pipeline_mode<synchronous>, transform_indices = @transform_9, window_bounds = array<i64: 1, 32>}, {transform_indices = @transform_10, window_bounds = array<i64: 1, 16, 32>}]} {
    %c0_i32 = arith.constant 0 : i32
    %0 = arith.cmpi eq, %arg1, %c0_i32 : i32
    %1 = arith.extui %0 : i1 to i32
    %c0_i32_0 = arith.constant 0 : i32
    %2 = arith.cmpi ne, %1, %c0_i32_0 : i32
    scf.if %2 {
      %c0_10 = arith.constant 0 : index
      %c0_11 = arith.constant 0 : index
      %c0_12 = arith.constant 0 : index
      %14 = vector.load %arg3[%c0_10, %c0_11, %c0_12] : memref<1x8x32xbf16, #tpu.memory_space<vmem>>, vector<1x8x32xbf16>
      %15 = vector.shape_cast %14 : vector<1x8x32xbf16> to vector<8x32xbf16>
      %c0_i32_13 = arith.constant 0 : i32
      %c8_i32_14 = arith.constant 8 : i32
      %16 = arith.addi %c0_i32_13, %c8_i32_14 : i32
      %c1_i32_15 = arith.constant 1 : i32
      scf.for %arg15 = %c0_i32_13 to %16 step %c1_i32_15  : i32 {
        %17 = arith.index_cast %arg15 : i32 to index
        %c0_17 = arith.constant 0 : index
        %c0_18 = arith.constant 0 : index
        %18 = vector.load %arg6[%17, %c0_17, %c0_18] : memref<8x32x4xbf16, #tpu.memory_space<vmem>>, vector<1x32x4xbf16>
        %19 = vector.shape_cast %18 : vector<1x32x4xbf16> to vector<32x4xbf16>
        %cst_19 = arith.constant dense<0.000000e+00> : vector<8x4xf32>
        %20 = tpu.matmul %15, %19, %cst_19 {dimension_numbers = #tpu.dot_dimension_numbers<[1], [0], [0], [1], [0, 0, 1, 1], [], []>} : vector<8x32xbf16>, vector<32x4xbf16>, vector<8x4xf32> -> vector<8x4xf32>
        %21 = arith.index_cast %arg15 : i32 to index
        %c0_20 = arith.constant 0 : index
        %c0_21 = arith.constant 0 : index
        %22 = vector.load %arg7[%21, %c0_20, %c0_21] : memref<8x1x4xf32, #tpu.memory_space<vmem>>, vector<1x1x4xf32>
        %23 = vector.shape_cast %22 : vector<1x1x4xf32> to vector<1x4xf32>
        %24 = vector.broadcast %23 : vector<1x4xf32> to vector<8x4xf32>
        %25 = arith.addf %20, %24 : vector<8x4xf32>
        %26 = arith.index_cast %arg15 : i32 to index
        %c0_22 = arith.constant 0 : index
        %c0_23 = arith.constant 0 : index
        %27 = vector.load %arg8[%26, %c0_22, %c0_23] : memref<8x32x4xbf16, #tpu.memory_space<vmem>>, vector<1x32x4xbf16>
        %28 = vector.shape_cast %27 : vector<1x32x4xbf16> to vector<32x4xbf16>
        %cst_24 = arith.constant dense<0.000000e+00> : vector<8x4xf32>
        %29 = tpu.matmul %15, %28, %cst_24 {dimension_numbers = #tpu.dot_dimension_numbers<[1], [0], [0], [1], [0, 0, 1, 1], [], []>} : vector<8x32xbf16>, vector<32x4xbf16>, vector<8x4xf32> -> vector<8x4xf32>
        %30 = arith.index_cast %arg15 : i32 to index
        %c0_25 = arith.constant 0 : index
        %c0_26 = arith.constant 0 : index
        %31 = vector.load %arg9[%30, %c0_25, %c0_26] : memref<8x1x4xf32, #tpu.memory_space<vmem>>, vector<1x1x4xf32>
        %32 = vector.shape_cast %31 : vector<1x1x4xf32> to vector<1x4xf32>
        %33 = vector.broadcast %32 : vector<1x4xf32> to vector<8x4xf32>
        %34 = arith.addf %29, %33 : vector<8x4xf32>
        %35 = arith.truncf %25 : vector<8x4xf32> to vector<8x4xbf16>
        %36 = arith.index_cast %arg15 : i32 to index
        %c0_27 = arith.constant 0 : index
        %c0_28 = arith.constant 0 : index
        %37 = vector.load %arg13[%36, %c0_27, %c0_28] : memref<8x8x4xbf16, #tpu.memory_space<vmem>>, vector<1x8x4xbf16>
        %38 = vector.shape_cast %37 : vector<1x8x4xbf16> to vector<8x4xbf16>
        %39 = vector.shape_cast %35 : vector<8x4xbf16> to vector<1x8x4xbf16>
        tpu.vector_store %arg13[%36, %c0_27, %c0_28], %39 {strides = array<i32>} : memref<8x8x4xbf16, #tpu.memory_space<vmem>>, vector<1x8x4xbf16>,
        %40 = arith.truncf %34 : vector<8x4xf32> to vector<8x4xbf16>
        %41 = arith.index_cast %arg15 : i32 to index
        %c0_29 = arith.constant 0 : index
        %c0_30 = arith.constant 0 : index
        %42 = vector.load %arg14[%41, %c0_29, %c0_30] : memref<8x8x4xbf16, #tpu.memory_space<vmem>>, vector<1x8x4xbf16>
        %43 = vector.shape_cast %42 : vector<1x8x4xbf16> to vector<8x4xbf16>
        %44 = vector.shape_cast %40 : vector<8x4xbf16> to vector<1x8x4xbf16>
        tpu.vector_store %arg14[%41, %c0_29, %c0_30], %44 {strides = array<i32>} : memref<8x8x4xbf16, #tpu.memory_space<vmem>>, vector<1x8x4xbf16>,
      }
      %c8_i32_16 = arith.constant 8 : i32
    } else {
    }
    %c0 = arith.constant 0 : index
    %c0_1 = arith.constant 0 : index
    %c0_2 = arith.constant 0 : index
    %3 = vector.load %arg2[%c0, %c0_1, %c0_2] : memref<1x16x32xbf16, #tpu.memory_space<vmem>>, vector<1x16x32xbf16>
    %4 = vector.shape_cast %3 : vector<1x16x32xbf16> to vector<16x32xbf16>
    %cst = arith.constant 0.000000e+00 : f32
    %5 = vector.broadcast %cst : f32 to vector<16x32xf32>
    %c0_i32_3 = arith.constant 0 : i32
    %c8_i32 = arith.constant 8 : i32
    %6 = arith.addi %c0_i32_3, %c8_i32 : i32
    %c1_i32 = arith.constant 1 : i32
    %7 = scf.for %arg15 = %c0_i32_3 to %6 step %c1_i32 iter_args(%arg16 = %5) -> (vector<16x32xf32>)  : i32 {
      %14 = arith.index_cast %arg15 : i32 to index
      %c0_10 = arith.constant 0 : index
      %c0_11 = arith.constant 0 : index
      %15 = vector.load %arg4[%14, %c0_10, %c0_11] : memref<8x32x4xbf16, #tpu.memory_space<vmem>>, vector<1x32x4xbf16>
      %16 = vector.shape_cast %15 : vector<1x32x4xbf16> to vector<32x4xbf16>
      %cst_12 = arith.constant dense<0.000000e+00> : vector<16x4xf32>
      %17 = tpu.matmul %4, %16, %cst_12 {dimension_numbers = #tpu.dot_dimension_numbers<[1], [0], [0], [1], [0, 0, 1, 1], [], []>} : vector<16x32xbf16>, vector<32x4xbf16>, vector<16x4xf32> -> vector<16x4xf32>
      %18 = arith.index_cast %arg15 : i32 to index
      %c0_13 = arith.constant 0 : index
      %c0_14 = arith.constant 0 : index
      %19 = vector.load %arg5[%18, %c0_13, %c0_14] : memref<8x1x4xf32, #tpu.memory_space<vmem>>, vector<1x1x4xf32>
      %20 = vector.shape_cast %19 : vector<1x1x4xf32> to vector<1x4xf32>
      %21 = vector.broadcast %20 : vector<1x4xf32> to vector<16x4xf32>
      %22 = arith.addf %17, %21 : vector<16x4xf32>
      %23 = arith.truncf %22 : vector<16x4xf32> to vector<16x4xbf16>
      %24 = arith.index_cast %arg15 : i32 to index
      %c0_15 = arith.constant 0 : index
      %c0_16 = arith.constant 0 : index
      %25 = vector.load %arg13[%24, %c0_15, %c0_16] : memref<8x8x4xbf16, #tpu.memory_space<vmem>>, vector<1x8x4xbf16>
      %26 = vector.shape_cast %25 : vector<1x8x4xbf16> to vector<8x4xbf16>
      %27 = arith.index_cast %arg15 : i32 to index
      %c0_17 = arith.constant 0 : index
      %c0_18 = arith.constant 0 : index
      %28 = vector.load %arg14[%27, %c0_17, %c0_18] : memref<8x8x4xbf16, #tpu.memory_space<vmem>>, vector<1x8x4xbf16>
      %29 = vector.shape_cast %28 : vector<1x8x4xbf16> to vector<8x4xbf16>
      %cst_19 = arith.constant dense<0.000000e+00> : vector<16x8xf32>
      %30 = tpu.matmul %23, %26, %cst_19 {dimension_numbers = #tpu.dot_dimension_numbers<[1], [1], [0], [0], [0, 0, 1, 0], [], []>} : vector<16x4xbf16>, vector<8x4xbf16>, vector<16x8xf32> -> vector<16x8xf32>
      %cst_20 = arith.constant 5.000000e-01 : f32
      %31 = vector.broadcast %cst_20 : f32 to vector<16x8xf32>
      %32 = arith.mulf %30, %31 : vector<16x8xf32>
      %cst_21 = arith.constant dense<0xFF800000> : vector<16xf32>
      %33 = vector.multi_reduction <maximumf>, %32, %cst_21 [1] : vector<16x8xf32> to vector<16xf32>
      %34 = vector.shape_cast %33 : vector<16xf32> to vector<16x1xf32>
      %35 = vector.broadcast %34 : vector<16x1xf32> to vector<16x8xf32>
      %36 = arith.subf %32, %35 : vector<16x8xf32>
      %37 = math.exp %36 : vector<16x8xf32>
      %cst_22 = arith.constant dense<0.000000e+00> : vector<16xf32>
      %38 = vector.multi_reduction <add>, %37, %cst_22 [1] : vector<16x8xf32> to vector<16xf32>
      %39 = vector.shape_cast %38 : vector<16xf32> to vector<16x1xf32>
      %40 = tpu.reciprocal %39 {approx = true} : vector<16x1xf32> -> vector<16x1xf32>
      %41 = vector.broadcast %40 : vector<16x1xf32> to vector<16x8xf32>
      %42 = arith.mulf %37, %41 : vector<16x8xf32>
      %43 = arith.truncf %42 : vector<16x8xf32> to vector<16x8xbf16>
      %cst_23 = arith.constant dense<0.000000e+00> : vector<16x4xf32>
      %44 = tpu.matmul %43, %29, %cst_23 {dimension_numbers = #tpu.dot_dimension_numbers<[1], [0], [0], [1], [0, 0, 1, 1], [], []>} : vector<16x8xbf16>, vector<8x4xbf16>, vector<16x4xf32> -> vector<16x4xf32>
      %45 = arith.truncf %44 : vector<16x4xf32> to vector<16x4xbf16>
      %46 = arith.index_cast %arg15 : i32 to index
      %c0_24 = arith.constant 0 : index
      %c0_25 = arith.constant 0 : index
      %47 = vector.load %arg10[%46, %c0_24, %c0_25] : memref<8x4x32xbf16, #tpu.memory_space<vmem>>, vector<1x4x32xbf16>
      %48 = vector.shape_cast %47 : vector<1x4x32xbf16> to vector<4x32xbf16>
      %cst_26 = arith.constant dense<0.000000e+00> : vector<16x32xf32>
      %49 = tpu.matmul %45, %48, %cst_26 {dimension_numbers = #tpu.dot_dimension_numbers<[1], [0], [0], [1], [0, 0, 1, 1], [], []>} : vector<16x4xbf16>, vector<4x32xbf16>, vector<16x32xf32> -> vector<16x32xf32>
      %50 = arith.addf %arg16, %49 : vector<16x32xf32>
      scf.yield %50 : vector<16x32xf32>
    }
    %c8_i32_4 = arith.constant 8 : i32
    %c0_5 = arith.constant 0 : index
    %c0_6 = arith.constant 0 : index
    %8 = vector.load %arg11[%c0_5, %c0_6] : memref<1x32xf32, #tpu.memory_space<vmem>>, vector<1x32xf32>
    %9 = vector.broadcast %8 : vector<1x32xf32> to vector<16x32xf32>
    %10 = arith.addf %7, %9 : vector<16x32xf32>
    %c0_7 = arith.constant 0 : index
    %c0_8 = arith.constant 0 : index
    %c0_9 = arith.constant 0 : index
    %11 = vector.load %arg12[%c0_7, %c0_8, %c0_9] : memref<1x16x32xf32, #tpu.memory_space<vmem>>, vector<1x16x32xf32>
    %12 = vector.shape_cast %11 : vector<1x16x32xf32> to vector<16x32xf32>
    %13 = vector.shape_cast %10 : vector<16x32xf32> to vector<1x16x32xf32>
    tpu.vector_store %arg12[%c0_7, %c0_8, %c0_9], %13 {strides = array<i32>} : memref<1x16x32xf32, #tpu.memory_space<vmem>>, vector<1x16x32xf32>,
    return
  }
  func.func @transform_0(%arg0: i32, %arg1: i32) -> (i32, i32, i32) {
    %c0_i32 = arith.constant 0 : i32
    %c0_i32_0 = arith.constant 0 : i32
    return %arg0, %arg1, %c0_i32 : i32, i32, i32
  }
  func.func @transform_1(%arg0: i32, %arg1: i32) -> (i32, i32, i32) {
    %c0_i32 = arith.constant 0 : i32
    %c0_i32_0 = arith.constant 0 : i32
    %c0_i32_1 = arith.constant 0 : i32
    return %arg0, %c0_i32, %c0_i32_0 : i32, i32, i32
  }
  func.func @transform_2(%arg0: i32, %arg1: i32) -> (i32, i32, i32) {
    %c0_i32 = arith.constant 0 : i32
    %c0_i32_0 = arith.constant 0 : i32
    %c0_i32_1 = arith.constant 0 : i32
    %c0_i32_2 = arith.constant 0 : i32
    return %c0_i32, %c0_i32_0, %c0_i32_1 : i32, i32, i32
  }
  func.func @transform_3(%arg0: i32, %arg1: i32) -> (i32, i32, i32) {
    %c0_i32 = arith.constant 0 : i32
    %c0_i32_0 = arith.constant 0 : i32
    %c0_i32_1 = arith.constant 0 : i32
    %c0_i32_2 = arith.constant 0 : i32
    return %c0_i32, %c0_i32_0, %c0_i32_1 : i32, i32, i32
  }
  func.func @transform_4(%arg0: i32, %arg1: i32) -> (i32, i32, i32) {
    %c0_i32 = arith.constant 0 : i32
    %c0_i32_0 = arith.constant 0 : i32
    %c0_i32_1 = arith.constant 0 : i32
    %c0_i32_2 = arith.constant 0 : i32
    return %c0_i32, %c0_i32_0, %c0_i32_1 : i32, i32, i32
  }
  func.func @transform_5(%arg0: i32, %arg1: i32) -> (i32, i32, i32) {
    %c0_i32 = arith.constant 0 : i32
    %c0_i32_0 = arith.constant 0 : i32
    %c0_i32_1 = arith.constant 0 : i32
    %c0_i32_2 = arith.constant 0 : i32
    return %c0_i32, %c0_i32_0, %c0_i32_1 : i32, i32, i32
  }
  func.func @transform_6(%arg0: i32, %arg1: i32) -> (i32, i32, i32) {
    %c0_i32 = arith.constant 0 : i32
    %c0_i32_0 = arith.constant 0 : i32
    %c0_i32_1 = arith.constant 0 : i32
    %c0_i32_2 = arith.constant 0 : i32
    return %c0_i32, %c0_i32_0, %c0_i32_1 : i32, i32, i32
  }
  func.func @transform_7(%arg0: i32, %arg1: i32) -> (i32, i32, i32) {
    %c0_i32 = arith.constant 0 : i32
    %c0_i32_0 = arith.constant 0 : i32
    %c0_i32_1 = arith.constant 0 : i32
    %c0_i32_2 = arith.constant 0 : i32
    return %c0_i32, %c0_i32_0, %c0_i32_1 : i32, i32, i32
  }
  func.func @transform_8(%arg0: i32, %arg1: i32) -> (i32, i32, i32) {
    %c0_i32 = arith.constant 0 : i32
    %c0_i32_0 = arith.constant 0 : i32
    %c0_i32_1 = arith.constant 0 : i32
    %c0_i32_2 = arith.constant 0 : i32
    return %c0_i32, %c0_i32_0, %c0_i32_1 : i32, i32, i32
  }
  func.func @transform_9(%arg0: i32, %arg1: i32) -> (i32, i32) {
    %c0_i32 = arith.constant 0 : i32
    %c0_i32_0 = arith.constant 0 : i32
    %c0_i32_1 = arith.constant 0 : i32
    return %c0_i32, %c0_i32_0 : i32, i32
  }
  func.func @transform_10(%arg0: i32, %arg1: i32) -> (i32, i32, i32) {
    %c0_i32 = arith.constant 0 : i32
    %c0_i32_0 = arith.constant 0 : i32
    return %arg0, %arg1, %c0_i32 : i32, i32, i32
  }
}

</mosaic_0001>

<bundles_post_ra>
// kernel: tpu_custom_call.1
= control target key start
LH: loop header
LB: loop body
LE: loop exit
PB: predicated region body
PF: predicated region fallthrough
CT: control target
= control target key end

     0   :  { %15 = vsyncpa [#allocation5], 0  ;;  %s1591_s0 = inlined_call_operand.vmem [shape: bf16[2,16,32], index: 0, kind: input, shape index: {}]   ;;  %s1592_s1 = inlined_call_operand.vmem [shape: bf16[2,8,32], index: 1, kind: input, shape index: {}]   ;;  %s1593_s2 = inlined_call_operand.vmem [shape: bf16[8,32,4], index: 2, kind: input, shape index: {}]   ;;  %s1594_s3 = inlined_call_operand.vmem [shape: f32[8,1,4], index: 3, kind: input, shape index: {}]   ;;  %s1595_s4 = inlined_call_operand.vmem [shape: bf16[8,32,4], index: 4, kind: input, shape index: {}]   ;;  %s1596_s5 = inlined_call_operand.vmem [shape: f32[8,1,4], index: 5, kind: input, shape index: {}]   ;;  %s1597_s6 = inlined_call_operand.vmem [shape: bf16[8,32,4], index: 6, kind: input, shape index: {}]   ;;  %s1598_s7 = inlined_call_operand.vmem [shape: f32[8,1,4], index: 7, kind: input, shape index: {}]   ;;  %s1599_s8 = inlined_call_operand.vmem [shape: bf16[8,4,32], index: 8, kind: input, shape index: {}]   ;;  %s1600_s9 = inlined_call_operand.vmem [shape: f32[1,32], index: 9, kind: input, shape index: {}]   ;;  %s1601_s10 = inlined_call_operand.hbm [shape: f32[2,16,32], index: 10, kind: output, shape index: {}]  }
   0x1   :  { %17 = vsyncpa [#allocation5 + $0x1], 0  ;;  %s1370_s13 = smov 0   ;;  %s1372_s14 = smov 0  }
   0x2   :  { %s1374_s15 = smov 0   ;;  %s1376_s16 = smov 0  }
   0x3   :  { %s1378_s17 = smov 0   ;;  %s1380_s18 = smov 0  }
   0x4 LB: > { %1604 = sst [smem:[#allocation7_spill]] %s1286_s17  ;;  %s988_s19 = sadd.s32 4294967295, %s1290_s18   ;;  %s1290_s18 = sphi %s1380_s18, %s23_s18   ;;  %s1286_s17 = sphi %s1378_s17, %s1613_s17   ;;  %s1282_s16 = sphi %s1376_s16, %s1612_s16   ;;  %s1278_s15 = sphi %s1374_s15, %s1616_s15   ;;  %s1274_s14 = sphi %s1372_s14, %s1615_s14   ;;  %s1270_s13 = sphi %s1370_s13, %s1614_s13  }
   0x5   : > { %s989_s20 = sadd.s32 4294967294, %s1290_s18   ;;  %s35_s21 = sadd.s32 1, %s1286_s17 }
   0x6   : > { %s266_s22 = sadd.s32 1, %s1278_s15  ;;  %p37_p0 = scmp.ge.s32.totalorder %s35_s21, 2 }
   0x7   : > { %p276_p1 = scmp.ne.s32.totalorder %s1278_s15, %s1274_s14  ;;  %p277_p2 = scmp.eq.s32.totalorder %s988_s19, 1 }
   0x8   : > { %p282_p3 = scmp.ne.s32.totalorder %s1274_s14, %s1270_s13  ;;  %s1618_s21 = smov (%p37_p0, %s35_s21), 0 }
   0x9   : > { %1605 = sst [smem:[#allocation8_spill]] %s1618_s21  ;;  %p1410_p4 = por %p277_p2, %p276_p1 }
   0xa   : > { %p283_p5 = scmp.eq.s32.totalorder %s989_s20, 1  ;;  %s261_s24 = ssub.s32 %s1286_s17, %s1618_s21 }
   0xb   : > { %p992_p6 = scmp.ge.s32.totalorder %s1290_s18, 1  ;;  %p264_p7 = scmp.eq.s32.totalorder %s261_s24, 0 }
   0xc   : > { %p1417_p8 = por %p283_p5, %p282_p3  ;;  %p345_p9 = scmp.lt.s32.totalorder %s1290_s18, 3 }
   0xd   : > { %s1423_s26 = scalar_select %p264_p7, %s1278_s15, %s266_s22  }
   0xe   : > { %p346_p10 = pnand %p992_p6, %p345_p9 }
   0xf   : > { %1608 = sst [smem:[#allocation9_spill]] %s1423_s26  ;;  %s388_s27 = sand.u32 (!%p346_p10), 1, %s1274_s14  }
  0x10   : > { %349 = sbr.rel (%p346_p10) target bundleno = 1374 (0x55e), region = 60  ;;  %p392_p11 = scmp.lt.s32.totalorder (!%p346_p10), %s1282_s16, 1 }
  0x11   : > { %s993_s28 = sshll.u32 (!%p346_p10), %s388_s27, 4  ;;  %s1440_s26 = smov (!%p346_p10), 0  }
  0x12   : > { %s1438_s17 = scalar_lea.vmem (!%p346_p10), [#allocation4], %s993_s28 }
  0x15   : > { %s393_s29 = scalar_select %p392_p11, %s1282_s16, 1 }
  0x17   : > { %s1029_s30 = sshll.u32 %s393_s29, 3  ;;  %s996_s11 = sshll.u32 %s393_s29, 2 }
  0x18   : > { %s1433_s20 = scalar_lea.vmem %s1591_s0, %s1029_s30  ;;  %s404_s21 = scalar_lea.vmem %s1592_s1, %s996_s11 }
  0x19   : > { %v411_v0 = vld [vmem:[%s404_s21] sm:$0xf] }
  0x1a LB: >> { %v1308_v1 = vmov 0.0   ;;  %s1030_s29 = sshll.u32 %s1294_s26, 4  ;;  %vm1309_vm0 = vmmov 0   ;;  %vm445_vm1 = vcmask 261120   ;;  %s495_s28 = scalar_lea.vmem %s1598_s7, %s1294_s26  ;;  %vm558_vm2 = vcmask 27648   ;;  %s1294_s26 = sphi %s1440_s26, %s417_s26  }
  0x1b   : >> { %1049 = vmatprep.subr.bf16.mxu0 %v1308_v1  ;;  %1057 = vmatprep.subr.bf16.mxu1 %v1308_v1  ;;  %s420_s21 = scalar_lea.vmem %s1595_s4, %s1030_s29  ;;  %s490_s19 = scalar_lea.vmem %s1597_s6, %s1030_s29  ;;  %v1004_v7 = vld [vmem:[%s495_s28] ss:$0 sm:$0xff] }
  0x1c   : >> { %1053 = vmatprep.mubr.msk.bf16.mxu0 %vm1309_vm0, %v1308_v1  ;;  %1061 = vmatprep.mubr.msk.bf16.mxu1 %vm1309_vm0, %v1308_v1  ;;  %v1184_v2 = vld [vmem:[%s420_s21 + $0x8] sm:$0xff]   ;;  %v1186_v4 = vld [vmem:[%s420_s21] sm:$0xff]   ;;  %s425_s29 = scalar_lea.vmem %s1596_s5, %s1294_s26  ;;  %s1008_s21 = sshll.u32 %s1294_s26, 2 }
  0x1d   : >> { %v1185_v3 = vld [vmem:[%s490_s19 + $0x8] sm:$0xff]   ;;  %1050 = vmatpush3.bf16.msra.mxu0 %v1184_v2  ;;  %v1187_v5 = vld [vmem:[%s490_s19] sm:$0xff]   ;;  %s557_s12 = scalar_lea.vmem [#allocation2], %s1008_s21  ;;  %s562_s19 = scalar_lea.vmem [#allocation3], %s1008_s21 }
  0x1e   : >> { %1058 = vmatpush3.bf16.msra.mxu1 %v1185_v3  ;;  %1051 = vmatprep.subr.bf16.mxu0 %v1308_v1  ;;  %v999_v6 = vld [vmem:[%s425_s29] ss:$0 sm:$0xff]  ;;  %s417_s26 = sadd.s32 1, %s1294_s26  }
  0x1f   : >> { %1059 = vmatprep.subr.bf16.mxu1 %v1308_v1  ;;  %p414_p12 = scmp.ge.s32.totalorder %s417_s26, 8  }
  0x20   : > { %v1467_v20 = vld [vmem:[%s1433_s20] sm:$0xf] (%p414_p12)  ;;  %v1470_v21 = vld [vmem:[%s1433_s20 + $0x4] sm:$0xf] (%p414_p12)  ;;  %v1472_v22 = vmov (%p414_p12), 0.0   ;;  %v1474_v23 = vmov (%p414_p12), 0.0  }
  0x21   : >> { %1052 = vmatpush3.bf16.msra.mxu0 %v1186_v4  ;;  %s1476_s22 = smov (%p414_p12), 0  }
  0x22   : >> { %1060 = vmatpush3.bf16.msra.mxu1 %v1187_v5 }
  0x24   : >> { %1054 = vmatmul.mubr.msk.bf16.vlgmr.msra.gmra.mxu0 %vm445_vm1, %v411_v0 }
  0x25   : >> { %1062 = vmatmul.mubr.msk.bf16.vlgmr.msra.gmra.mxu1 %vm445_vm1, %v411_v0 }
  0xe4   : >> { %v483_v8 = vpop.f32.mrf.mxu0 }
  0xe5   : >> { %v484_v9 = vadd.f32 %v999_v6, %v483_v8  ;;  %v549_v10 = vpop.f32.mrf.mxu1 }
  0xe6   : >> { %v550_v11 = vadd.f32 %v1004_v7, %v549_v10  ;;  %v1055_v12 = vpop.f32.mrf.mxu0 }
  0xe7   : >> { %v555_v13 = vpack.c.bf16 %v484_v9, %v484_v9  ;;  %v1063_v14 = vpop.f32.mrf.mxu1  ;;  %416 = sbr.rel (!%p414_p12) target bundleno = 26 (0x1a), region = 127 }
  0xe8   : >> { %v560_v15 = vpack.c.bf16 %v550_v11, %v550_v11  ;;  %v486_v16 = vpop.f32.mrf.mxu0 }
  0xe9   : >> { %559 = vst.msk [vmem:[%s557_s12] sm:$0xf] %vm558_vm2, %v555_v13  ;;  %v552_v17 = vpop.f32.mrf.mxu1 }
  0xea   : >> { %563 = vst.msk [vmem:[%s562_s19] sm:$0xf] %vm558_vm2, %v560_v15  ;;  %v1056_v18 = vpop.f32.mrf.mxu0 }
  0xeb   : >> { %v1064_v19 = vpop.f32.mrf.mxu1 }
  0xec LB: >> { %v1310_v24 = vmov 0.0   ;;  %vm1311_vm3 = vmmov 0   ;;  %s1032_s26 = sshll.u32 %s1306_s22, 4  ;;  %v1013_v27 = vcombine.low %v1467_v20, %v1470_v21  ;;  %s1017_s30 = sshll.u32 %s1306_s22, 2  ;;  %vm658_vm4 = vcmask 31744   ;;  %s1306_s22 = sphi %s1476_s22, %s571_s22   ;;  %v1302_v23 = vphi %v1474_v23, %v1610_v23   ;;  %v1298_v22 = vphi %v1472_v22, %v1609_v22  }
  0xed   : >> { %1065 = vmatprep.subr.bf16.mxu0 %v1310_v24  ;;  %1069 = vmatprep.mubr.msk.bf16.mxu0 %vm1311_vm3, %v1310_v24  ;;  %s576_s29 = scalar_lea.vmem %s1593_s2, %s1032_s26  ;;  %s653_s11 = scalar_lea.vmem [#allocation2], %s1017_s30  ;;  %vm708_vm5 = vcmask 64512   ;;  %vm735_vm6 = vcmask 1043456   ;;  %vm787_vm7 = vcmask 1041408  }
  0xee   : >> { %1073 = vmatprep.subr.bf16.mxu1 %v1310_v24  ;;  %1075 = vmatprep.mubr.msk.bf16.mxu1 %vm1311_vm3, %v1310_v24  ;;  %v1188_v25 = vld [vmem:[%s576_s29 + $0x8] sm:$0xff]   ;;  %v1189_v26 = vld [vmem:[%s576_s29] sm:$0xff]   ;;  %s581_s12 = scalar_lea.vmem %s1594_s3, %s1306_s22  ;;  %s656_s19 = scalar_lea.vmem [#allocation3], %s1017_s30 }
  0xef   : >> { %1066 = vmatpush3.bf16.msra.mxu0 %v1188_v25  ;;  %v1012_v31 = vld [vmem:[%s581_s12] ss:$0 sm:$0xff]  ;;  %s1021_s26 = sshll.u32 %s1306_s22, 1  ;;  %s571_s22 = sadd.s32 1, %s1306_s22  }
  0xf0   : >> { %1067 = vmatprep.subr.bf16.mxu0 %v1310_v24  ;;  %v654_v28 = vld [vmem:[%s653_s11] sm:$0xf]  ;;  %s782_s29 = scalar_lea.vmem %s1599_s8, %s1021_s26  ;;  %p568_p13 = scmp.ge.s32.totalorder %s571_s22, 8  }
  0xf1   : >> { %v663_v29 = vsel %vm658_vm4, %v654_v28, 0  ;;  %v657_v56 = vld [vmem:[%s656_s19] sm:$0xf]  ;;  %s1033_s28 = sshll.u32 (%p568_p13), %s1282_s16, 8  ;;  %s862_s22 = sshll.u32 (%p568_p13), %s1438_s17, 4  ;;  %s1538_s22 = int_to_ptr.vmem [resolvable:$true] %s862_s22 }
  0xf2   : >> { %1074 = vmatpush3.bf16.xpose.msra.mxu1 %v663_v29  ;;  %v737_v57 = vsel %vm735_vm6, %v657_v56, 0  ;;  %v783_v58 = vld [vmem:[%s782_s29] sm:$0x3]  ;;  %s1535_s19 = scalar_lea.hbm (%p568_p13), %s1601_s10, %s1033_s28  ;;  %s1546_s26 = scalar_lea.sflag (%p568_p13), [#allocation5], %s388_s27 }
  0xf3   : >> { %1068 = vmatpush3.bf16.msra.mxu0 %v1189_v26  ;;  %1085 = vmatprep.subr.bf16.mxu1 %v1310_v24  ;;  %v789_v59 = vsel %vm787_vm7, %v783_v58, 0  ;;  %v1023_v14 = vld [vmem:[%s1600_s9] ss:$0 sm:$0xff] (%p568_p13)  ;;  %s1198_s16 = scalar_lea.vmem (%p568_p13), %s1538_s22, 256  ;;  %s1312_s20 = smov (%p568_p13), [#allocation4]  }
  0xf4   : >> { %1079 = vmatprep.subr.bf16.mxu0 %v1310_v24  ;;  %p1199_p0 = scmp.ne.s32.totalorder (%p568_p13), %s1538_s22, %s1198_s16  ;;  %s1202_s24 = sshll.u32 (%p568_p13), %s1312_s20, 4  ;;  %s1203_s24 = int_to_ptr.vmem [resolvable:$false] %s1202_s24 }
  0xf5   : > { %s1204_s29 = scalar_lea.vmem (%p568_p13), %s1203_s24, 512  ;;  %p1205_p3 = scmp.lt.s32.totalorder (%p568_p13), %s1538_s22, %s1203_s24 }
  0xf6   : >> { %1070 = vmatmul.mubr.msk.bf16.vlgmr.msra.gmra.mxu0 %vm445_vm1, %v1013_v27  ;;  %p1200_p1 = pnand (%p568_p13), %p1199_p0, %p1410_p4  ;;  %p1206_p5 = scmp.lt.s32.totalorder (%p568_p13), %s1204_s29, %s1198_s16 }
  0xf7   : >> { %1081 = vmatprep.mubr.msk.bf16.mxu0 %vm1311_vm3, %v1310_v24  ;;  %1080 = vmatpush3.bf16.msra.mxu0 %v737_v57 }
  0xf8   : > { %p1201_p2 = pneg (%p568_p13), %p1200_p1  ;;  %p1207_p6 = por (%p568_p13), %p1206_p5, %p1205_p3 }
  0xfa   : > { %p1208_p7 = pnand (%p568_p13), %p1207_p6, %p1201_p2 }
 0x1b6   : >> { %v644_v30 = vpop.f32.mrf.mxu0 }
 0x1b7   : >> { %v645_v34 = vadd.f32 %v1012_v31, %v644_v30 }
 0x1b8   : >> { %v1071_v32 = vpop.f32.mrf.mxu0 }
 0x1ba   : >> { %v647_v33 = vpop.f32.mrf.mxu0 }
 0x1bb   : >> { %v648_v35 = vadd.f32 %v1012_v31, %v647_v33 }
 0x1bc   : >> { %v1072_v36 = vpop.f32.mrf.mxu0 }
 0x1bd   : >> { %v651_v37 = vpack.c.bf16 %v648_v35, %v645_v34 }
 0x1bf   : >> { %1076 = vmatmul.mubr.msk.bf16.vlgmr.msra.gmra.mxu1 %vm658_vm4, %v651_v37 }
 0x1c0   : >> { %1087 = vmatprep.mubr.msk.bf16.mxu1 %vm1311_vm3, %v1310_v24  ;;  %1086 = vmatpush3.bf16.msra.mxu1 %v789_v59 }
 0x27f   : >> { %v699_v38 = vpop.f32.mrf.mxu1 }
 0x280   : >> { %v706_v39 = vmul.f32 0.5, %v699_v38 }
 0x281   : >> { %v1077_v40 = vpop.f32.mrf.mxu1 }
 0x282   : >> { %v709_v41 = vsel %vm708_vm5, %v706_v39, -inf }
 0x283   : >> { %710 = vmax.xlane.f32.xlu0 %v709_v41  ;;  %v702_v42 = vpop.f32.mrf.mxu1 }
 0x284   : >> { %v707_v43 = vmul.f32 0.5, %v702_v42 }
 0x285   : >> { %v1078_v44 = vpop.f32.mrf.mxu1 }
 0x286   : >> { %v712_v45 = vsel %vm708_vm5, %v707_v43, -inf }
 0x287   : >> { %713 = vmax.xlane.f32.xlu0 %v712_v45 }
 0x30c   : >> { %v711_v46 = vpop.xlane.xlu0 %710 }
 0x30d   : >> { %v715_v47 = vsub.f32 %v706_v39, %v711_v46 }
 0x30f   : >> { %v717_v48 = vmul.f32 1.442695, %v715_v47 }
 0x310   : >> { %v714_v49 = vpop.xlane.xlu0 %713 }
 0x311   : >> { %1190 = vpow2.f32 %v717_v48  ;;  %v716_v50 = vsub.f32 %v707_v43, %v714_v49 }
 0x313   : >> { %v719_v51 = vmul.f32 1.442695, %v716_v50 }
 0x315   : >> { %1192 = vpow2.f32 %v719_v51 }
 0x31e   : >> { %v1191_v52 = vpop.eup %1190 }
 0x31f   : >> { %v721_v53 = vsel %vm708_vm5, %v1191_v52, 0.0 }
 0x320   : >> { %722 = vadd.xlane.f32.xlu1 %v721_v53 }
 0x322   : >> { %v1193_v54 = vpop.eup %1192 }
 0x323   : >> { %v724_v55 = vsel %vm708_vm5, %v1193_v54, 0.0 }
 0x324   : >> { %725 = vadd.xlane.f32.xlu1 %v724_v55 }
 0x3a9   : >> { %v723_v60 = vpop.xlane.xlu1 %722 }
 0x3aa   : >> { %1194 = vrcp.f32 %v723_v60 }
 0x3ad   : >> { %v726_v61 = vpop.xlane.xlu1 %725 }
 0x3ae   : >> { %1196 = vrcp.f32 %v726_v61 }
 0x3b7   : >> { %v1195_v62 = vpop.eup %1194 }
 0x3b8   : >> { %v729_v1 = vmul.f32 %v1195_v62, %v1191_v52 }
 0x3bb   : >> { %v1197_v63 = vpop.eup %1196 }
 0x3bc   : >> { %v730_v0 = vmul.f32 %v1197_v63, %v1193_v54 }
 0x3be   : >> { %v731_v2 = vpack.c.bf16 %v730_v0, %v729_v1 }
 0x3c0   : >> { %1082 = vmatmul.mubr.msk.bf16.vlgmr.msra.gmra.mxu0 %vm708_vm5, %v731_v2 }
 0x480   : >> { %v773_v3 = vpop.f32.mrf.mxu0 }
 0x482   : >> { %v1083_v4 = vpop.f32.mrf.mxu0 }
 0x484   : >> { %v776_v5 = vpop.f32.mrf.mxu0 }
 0x485   : >> { %v780_v6 = vpack.c.bf16 %v776_v5, %v773_v3 }
 0x486   : >> { %v1084_v7 = vpop.f32.mrf.mxu0 }
 0x487   : >> { %1088 = vmatmul.mubr.msk.bf16.vlgmr.msra.gmra.mxu1 %vm658_vm4, %v780_v6 }
 0x547   : >> { %v825_v8 = vpop.f32.mrf.mxu1 }
 0x548   : >> { %v832_v9 = vadd.f32 %v1302_v23, %v825_v8  }
 0x549   : >> { %v1089_v10 = vpop.f32.mrf.mxu1 }
 0x54a   : >> { %v1610_v23 = vmov %v832_v9  ;;  %570 = sbr.rel (!%p568_p13) target bundleno = 236 (0xec), region = 138  ;;  %v841_v15 = vadd.f32 (%p568_p13), %v1023_v14, %v832_v9 }
 0x54b   : >> { %v828_v11 = vpop.f32.mrf.mxu1 }
 0x54c   : >> { %v833_v12 = vadd.f32 %v1298_v22, %v828_v11   ;;  %844 = vst.msk [vmem:[%s1438_s17] sm:$0xff] (%p568_p13), %vm445_vm1, %v841_v15 }
 0x54d   : >> { %v1090_v13 = vpop.f32.mrf.mxu1 }
 0x54e   : >> { %v1609_v22 = vmov %v833_v12  ;;  %v842_v16 = vadd.f32 (%p568_p13), %v1023_v14, %v833_v12 }
 0x550   : > { %845 = vst.msk [vmem:[%s1438_s17 + $0x8] sm:$0xff] %vm445_vm1, %v842_v16 }
 0x551   : > { %1211 = shalt.err (!%p1208_p7)
}
 0x552   : > { %s1212_s17 = scalar_lea.hbm %s1535_s19, 256  ;;  %s1216_s11 = scalar_lea.hbm %s1601_s10, 512 }
 0x553   : > { %p1213_p9 = scmp.ne.s32.totalorder %s1535_s19, %s1212_s17  ;;  %p1217_p12 = scmp.lt.s32.totalorder %s1535_s19, %s1601_s10 }
 0x554   : > { %p1218_p13 = scmp.lt.s32.totalorder %s1216_s11, %s1212_s17 }
 0x555   : > { %p1214_p10 = pnand %p1213_p9, %p1410_p4 }
 0x556   : > { %p1219_p0 = por %p1218_p13, %p1217_p12 }
 0x557   : > { %p1215_p11 = pneg %p1214_p10 }
 0x559   : > { %p1220_p1 = pnand %p1219_p0, %p1215_p11 }
 0x55b   : > { %1223 = shalt.err (!%p1220_p1)
}
 0x55c   : > { %s1313_s12 = smov 128   ;;  %s1314_s16 = smov 8  }
 0x55d   : > { %1091 = dma.vmem_to_hbm [thread:$0]  (%p1410_p4), %s1538_s22, 256, %s1535_s19, %s1546_s26, %s1313_s12, %s1313_s12, %s1314_s16  }
 0x55e PF: > { %p1097_p2 = scmp.ge.s32.totalorder %s1290_s18, 2  ;;  %s877_s20 = sand.u32 1, %s1270_s13  }
 0x55f   : > { %s878_s24 = scalar_lea.sflag [#allocation5], %s877_s20 }
 0x560   : > { %p1094_p3 = pnand %p1097_p2, %p1417_p8 }
 0x562   : > { %p1095_p5 = pneg %p1094_p3 }
 0x564   : > { %1265 = dma.done.wait (%p1095_p5), %s878_s24, 256  }
 0x565   : > { %1267 = vsyncadd (%p1095_p5), %s878_s24, 4294967040  ;;  %s23_s18 = sadd.s32 1, %s1290_s18   ;;  %s1611_s29 = sld [smem:[#allocation9_spill]] }
 0x566   : > { %p20_p6 = scmp.ge.s32.totalorder %s23_s18, 4   ;;  %s1612_s16 = sld [smem:[#allocation7_spill]] }
 0x567   : > { %s1613_s17 = sld [smem:[#allocation8_spill]]  ;;  %s1614_s13 = smov %s1274_s14 }
 0x568   : > { %s1615_s14 = smov %s1278_s15  ;;  %22 = sbr.rel (!%p20_p6) target bundleno = 4 (0x4), region = 149 }
 0x56b   : > { %s1616_s15 = smov %s1611_s29 }
 0x56d   :  { %883 = vsyncpa [#allocation5], 1 }
 0x56e   :  { %885 = vsyncpa [#allocation5 + $0x1], 1 }

</bundles_post_ra>
